<compile_context>
chip_gen: v6e
topology: v6e:2x2x1
jax: 0.10.0
libtpu: 0.0.40
codegen_flags: <defaults>
</compile_context>

<pallas_src>
import math
import functools

import jax
import jax.numpy as jnp
from jax import lax
from jax.experimental import pallas as pl
from jax.experimental.pallas import tpu as pltpu


# ----------------------------------------------------------------------------
# Generation-aware sizing helpers
# ----------------------------------------------------------------------------
def _vmem_capacity_bytes():
    try:
        return int(pltpu.get_tpu_info().vmem_capacity_bytes)
    except Exception:                       # API drift / interpret: assume 128 MiB
        return 128 << 20


_VMEM_CAP = _vmem_capacity_bytes()
_SMALL_VMEM = _VMEM_CAP <= (96 << 20)        # v7x-class part (64 MiB per core)
_VMEM_LIMIT = (32 << 20) if _SMALL_VMEM else (64 << 20)


def _pick_block_b(B, per_item_bytes, *, cap=128):
    """Batch-block size: as large as a VMEM budget allows, a multiple of 8 that
    divides B (sublane rule for the (bb, D)/(bb, L) blocks), else full B."""
    budget = _VMEM_CAP // 8                  # headroom for double buffering
    cap = max(1, min(cap, budget // max(per_item_bytes, 1)))
    if B <= cap:
        return B
    bb = (cap // 8) * 8
    while bb >= 8:
        if B % bb == 0:
            return bb
        bb -= 8
    # TODO(synk): pad B to a multiple of 8 instead of a single full-B block.
    return B


def _pick_tile_v(V, D, B):
    """V-tile for the scores matmul: big enough to amortize the ~0.35us grid
    step, budgeted against VMEM (v7x has 64 MiB physical)."""
    cap = 1024 if _SMALL_VMEM else 2048
    tv = min(V, cap)
    while tv > 128 and 8 * tv * (D + B) > _VMEM_CAP // 4:
        tv //= 2
    if tv >= V:
        return V                              # single full-extent block
    return tv


# ----------------------------------------------------------------------------
# Kernel 1: LocalAggregator (GAT-style attention over the session adjacency)
#           all 4 edge-type scores come from ONE MXU matmul with M = 4L:
#           rows [k*L:(k+1)*L] of the LHS are h*a_k, so that slice of the
#           result equals (h*a_k) @ h^T.
# ----------------------------------------------------------------------------
def local_agg_kernel(h_ref, adj_ref, a_ref, o_ref, *, alpha):
    h = h_ref[...]                            # (bb, L, D)
    adj = adj_ref[...]                        # (bb, L, L) int32
    a = a_ref[...]                            # (4, D)
    bb, L, D = h.shape

    hk = jnp.concatenate([h * a[k][None, None, :] for k in range(4)], axis=1)
    e = jnp.einsum("bid,bjd->bij", hk, h,
                   preferred_element_type=jnp.float32)        # (bb, 4L, L)
    e = jnp.where(e >= 0, e, alpha * e)                       # LeakyReLU

    neg = jnp.full(adj.shape, -9e15, dtype=jnp.float32)
    att = jnp.where(adj == 1, e[:, 0 * L:1 * L, :], neg)
    att = jnp.where(adj == 2, e[:, 1 * L:2 * L, :], att)
    att = jnp.where(adj == 3, e[:, 2 * L:3 * L, :], att)
    att = jnp.where(adj == 4, e[:, 3 * L:4 * L, :], att)

    att = att - jnp.max(att, axis=-1, keepdims=True)
    ex = jnp.exp(att)
    p = ex / jnp.sum(ex, axis=-1, keepdims=True)
    o_ref[...] = jnp.einsum("bij,bjd->bid", p, h,
                            preferred_element_type=jnp.float32).astype(o_ref.dtype)


def local_aggregate(h, adj, a_all, *, alpha, block_b=None):
    B, L, D = h.shape
    per_item = 4 * (7 * L * D + 9 * L * L)
    bb = _pick_block_b(B, per_item) if block_b is None else block_b
    cost = pl.CostEstimate(
        flops=2 * B * L * L * D * 5,
        transcendentals=B * L * L,
        bytes_accessed=4 * (2 * B * L * D + 2 * B * L * L),
    )
    return pl.pallas_call(
        functools.partial(local_agg_kernel, alpha=alpha),
        out_shape=jax.ShapeDtypeStruct((B, L, D), jnp.float32),
        grid=(B // bb,),
        in_specs=[
            pl.BlockSpec((bb, L, D), lambda b: (b, 0, 0)),
            pl.BlockSpec((bb, L, L), lambda b: (b, 0, 0)),
            pl.BlockSpec((4, D), lambda b: (0, 0)),
        ],
        out_specs=pl.BlockSpec((bb, L, D), lambda b: (b, 0, 0)),
        compiler_params=pltpu.CompilerParams(
            dimension_semantics=("parallel",), vmem_limit_bytes=_VMEM_LIMIT),
        cost_estimate=cost,
    )(h, adj.astype(jnp.int32), a_all)


# ----------------------------------------------------------------------------
# Kernel 2a: zh (GLU attention + gated fusion).  glu1/glu2 fused into one
#            (bb*L, 2D) @ (2D, D) matmul; [hidden+pos | h_mirror] comes in as
#            a single lane-dense operand built wrapper-side.
# ----------------------------------------------------------------------------
def zh_kernel(hphm_ref, hl_ref, mask_ref, w12_ref, w3t_ref, b3_ref,
              wrow_ref, gat_ref, gbt_ref, zh_ref, *, mu):
    hphm = hphm_ref[...]                       # (bb, L, 2D) = [hidden+pos | h_mirror]
    hl = hl_ref[...]                           # (bb, D)
    mask = mask_ref[...]                       # (bb, L) float
    bb, L, D2 = hphm.shape
    D = D2 // 2
    hp = hphm[..., :D]                         # hidden + pos (static lane slice)

    # fused GLU matmul (K = 2D) — the reshape only merges leading dims, the
    # minor dim is unchanged (layout-preserving for L % 8 == 0).
    lin = jnp.dot(hphm.reshape(bb * L, D2), w12_ref[...],
                  preferred_element_type=jnp.float32)
    hl3 = jnp.dot(hl, w3t_ref[...], preferred_element_type=jnp.float32) + b3_ref[...]
    nh = jax.nn.sigmoid(lin.reshape(bb, L, D) + hl3[:, None, :])

    # beta = nh @ w as a lane reduction (w passed as a (1, D) row).
    beta = jnp.sum(nh * wrow_ref[...][None, :, :], axis=-1, keepdims=True)  # (bb,L,1)
    beta = beta * mask[..., None]
    zg = jnp.sum(beta * hp, axis=1)                                         # (bb, D)

    gf = jax.nn.sigmoid(
        jnp.dot(zg, gat_ref[...], preferred_element_type=jnp.float32)
        + jnp.dot(hl, gbt_ref[...], preferred_element_type=jnp.float32)) * mu
    # F.dropout(zh, 0.2) skipped: eval mode.
    zh_ref[...] = (gf * hl + (1.0 - gf) * zg).astype(zh_ref.dtype)


# ----------------------------------------------------------------------------
# Kernel 2b: scores = zh @ item_w^T, V-tiled; item table streamed as (tile_v, D)
#            blocks (no transpose / pad materialization, no output slice).
# ----------------------------------------------------------------------------
def scores_kernel(zh_ref, item_ref, out_ref):
    out_ref[...] = lax.dot_general(
        zh_ref[...], item_ref[...],
        dimension_numbers=(((1,), (1,)), ((), ())),
        preferred_element_type=jnp.float32).astype(out_ref.dtype)


def compute_score_pallas(hidden, pos_emb, h_mirror, h_local, mask_f, item_w,
                         params, *, mu, block_b=None):
    B, L, D = hidden.shape
    V = item_w.shape[0]

    # Fused / transposed weights (tiny (D, D)-scale ops, done once per call).
    w12 = jnp.concatenate([params["glu1"].T, params["glu2"].T], axis=0)   # (2D, D)
    w3t = params["glu3_w"].T
    b3 = params["glu3_b"].reshape(1, D)
    wrow = params["w"].T                                                   # (1, D)
    gat = params["gate"][:, :D].T                                          # acts on zg
    gbt = params["gate"][:, D:].T                                          # acts on h_local

    # positional add + concat done wrapper-side: one lane-dense streamed operand.
    hphm = jnp.concatenate([hidden + pos_emb[None, :, :], h_mirror], axis=-1)

    per_item = 4 * (8 * L * D + 8 * D)
    bb = _pick_block_b(B, per_item) if block_b is None else block_b
    const = lambda r, c: pl.BlockSpec((r, c), lambda b: (0, 0))

    zh = pl.pallas_call(
        functools.partial(zh_kernel, mu=mu),
        out_shape=jax.ShapeDtypeStruct((B, D), jnp.float32),
        grid=(B // bb,),
        in_specs=[
            pl.BlockSpec((bb, L, 2 * D), lambda b: (b, 0, 0)),   # [hp | hm]
            pl.BlockSpec((bb, D), lambda b: (b, 0)),             # h_local
            pl.BlockSpec((bb, L), lambda b: (b, 0)),             # mask
            const(2 * D, D),                                     # [glu1.T; glu2.T]
            const(D, D), const(1, D), const(1, D),               # glu3.T, b3, w row
            const(D, D), const(D, D),                            # gate split (.T)
        ],
        out_specs=pl.BlockSpec((bb, D), lambda b: (b, 0)),
        compiler_params=pltpu.CompilerParams(
            dimension_semantics=("parallel",), vmem_limit_bytes=_VMEM_LIMIT),
    )(hphm, h_local, mask_f, w12, w3t, b3, wrow, gat, gbt)

    # ---- V-tiled scores matmul --------------------------------------------
    # TODO(synk): optionally stream the item table in bf16 (≈2x HBM savings on
    # this HBM-bound kernel) if the numerics tradeoff is acceptable.
    tile_v = _pick_tile_v(V, D, B)
    nv = pl.cdiv(V, tile_v)
    cost = pl.CostEstimate(
        flops=2 * B * D * nv * tile_v,
        transcendentals=0,
        bytes_accessed=4 * (B * D + V * D + B * V),
    )
    scores = pl.pallas_call(
        scores_kernel,
        out_shape=jax.ShapeDtypeStruct((B, V), jnp.float32),
        grid=(nv,),
        in_specs=[
            pl.BlockSpec((B, D), lambda v: (0, 0)),
            pl.BlockSpec((tile_v, D), lambda v: (v, 0)),
        ],
        out_specs=pl.BlockSpec((B, tile_v), lambda v: (0, v)),
        compiler_params=pltpu.CompilerParams(
            dimension_semantics=("parallel",), vmem_limit_bytes=_VMEM_LIMIT),
        cost_estimate=cost,
    )(zh, item_w)
    return scores


# ----------------------------------------------------------------------------
# Kernel 3: similarity (SSL) loss — batched blocks + VMEM scratch accumulator
# ----------------------------------------------------------------------------
def simi_loss_kernel(h1_ref, h2_ref, mask_ref, out_ref, acc_ref, *,
                     temp, inv_batch):
    step = pl.program_id(0)

    @pl.when(step == 0)
    def _():
        acc_ref[...] = jnp.zeros_like(acc_ref)

    h1 = h1_ref[...]                                       # (bb, L, D)
    h2 = h2_ref[...]                                       # (bb, L, D)
    sim = jnp.einsum("bid,bjd->bij", h1, h2,
                     preferred_element_type=jnp.float32) * (1.0 / temp)
    sim = sim - jnp.max(sim, axis=-1, keepdims=True)
    ex = jnp.exp(sim)
    p = ex / jnp.sum(ex, axis=-1, keepdims=True)
    loss = -jnp.log(p + 1e-8)                              # epsilon kept (matches spec)
    m = (mask_ref[...] == 1).astype(jnp.float32)
    acc_ref[...] = acc_ref[...] + jnp.sum(loss * m)

    @pl.when(step == pl.num_programs(0) - 1)
    def _():
        out_ref[...] = acc_ref[...] * inv_batch


def similarity_loss_pallas(hf1, hf2, simi_mask, *, temp, block_b=None):
    B, L, D = hf1.shape
    per_item = 4 * (2 * L * D + 5 * L * L)
    bb = _pick_block_b(B, per_item) if block_b is None else block_b
    # TODO(synk): on dual-TensorCore parts, split into two partial accumulators
    # (parallel outer axis) and sum outside to use both cores.
    out = pl.pallas_call(
        functools.partial(simi_loss_kernel, temp=temp, inv_batch=1.0 / B),
        out_shape=jax.ShapeDtypeStruct((1, 1), jnp.float32),
        grid=(B // bb,),
        in_specs=[
            pl.BlockSpec((bb, L, D), lambda b: (b, 0, 0)),
            pl.BlockSpec((bb, L, D), lambda b: (b, 0, 0)),
            pl.BlockSpec((bb, L, L), lambda b: (b, 0, 0)),
        ],
        out_specs=pl.BlockSpec((1, 1), lambda b: (0, 0)),
        scratch_shapes=[pltpu.VMEM((1, 1), jnp.float32)],
        compiler_params=pltpu.CompilerParams(
            dimension_semantics=("arbitrary",), vmem_limit_bytes=_VMEM_LIMIT),
    )(hf1, hf2, simi_mask.astype(jnp.int32))
    return out[0, 0]


# ----------------------------------------------------------------------------
# Parameters (uniform(-1/sqrt(D), 1/sqrt(D)) like reset_parameters)
# ----------------------------------------------------------------------------
def init_params(key, num_node, dim):
    stdv = 1.0 / math.sqrt(dim)
    ks = jax.random.split(key, 16)
    u = lambda k, shape: jax.random.uniform(k, shape, jnp.float32, -stdv, stdv)
    return {
        "embedding": u(ks[0], (num_node, dim)),
        "pos_embedding": u(ks[1], (200, dim)),
        "w": u(ks[2], (dim, 1)),
        "glu1": u(ks[3], (dim, dim)),          # nn.Linear weight (out, in)
        "glu2": u(ks[4], (dim, dim)),
        "glu3_w": u(ks[5], (dim, dim)),
        "glu3_b": u(ks[6], (dim,)),
        "gate": u(ks[7], (dim, 2 * dim)),
        "highway": u(ks[8], (dim, 2 * dim)),
        "la_a": u(ks[9], (4, dim)),            # LocalAggregator a_0..a_3
        "ma_w1": u(ks[10], (dim, 1)),          # MirrorAggregator (reconstructed)
        "ma_w2": u(ks[11], (dim, 1)),
        "aa_a": u(ks[12], (dim, 1)),           # AttributeAggregator (reconstructed)
    }


# ----------------------------------------------------------------------------
# Forward pass (glue in plain JAX, hot paths in Pallas)
# ----------------------------------------------------------------------------
def combine_graph_forward(params, inputs, adj, last_item_mask,
                          as_items, as_items_SSL, simi_mask,
                          *, hop=1, mu=0.01, alpha=0.2, temp=0.1):
    emb = params["embedding"]
    D = emb.shape[1]
    mask_item = inputs != 0
    h = emb[inputs]                                        # (B, L, D)

    # TODO(synk): AttributeAggregator source was not provided with the module;
    # reconstructed as masked attention over attribute neighbours + residual.
    # TODO(synk): the (B, L, S, D) neighbour gathers stay in XLA; a
    # PrefetchScalarGridSpec gather kernel would cut their HBM traffic further.
    ha = h * params["aa_a"][:, 0]                          # shared across both passes

    def attr_agg(as_list):
        aggs = []
        for nei in as_list:
            nei_emb = emb[nei]                              # (B, L, S, D)
            m = nei != 0
            e = jnp.einsum("bld,blsd->bls", ha, nei_emb)
            e = jnp.where(e >= 0, e, alpha * e)
            e = jnp.where(m, e, -9e15)
            p = jax.nn.softmax(e, axis=-1)
            aggs.append(jnp.einsum("bls,blsd->bld", p, nei_emb))
        return h + sum(aggs) / float(len(aggs))

    hf_1 = attr_agg(as_items)
    hf_2 = attr_agg(as_items_SSL)
    hf = 0.5 * (hf_1 + hf_2)

    x = h
    mirror_nodes = hf
    mf = mask_item[..., None].astype(jnp.float32)
    for _ in range(hop):
        # LocalAggregator — Pallas kernel 1
        x = local_aggregate(x, adj, params["la_a"], alpha=alpha)
        # TODO(synk): MirrorAggregator source not provided; reconstructed as a
        # gated exchange between session nodes and mirror nodes.
        a1 = jax.nn.sigmoid(jnp.matmul(mirror_nodes * x, params["ma_w1"]))
        a2 = jax.nn.sigmoid(jnp.matmul(mirror_nodes * x, params["ma_w2"]))
        x_new = (a1 * x + (1.0 - a1) * mirror_nodes) * mf
        mirror_new = (a2 * mirror_nodes + (1.0 - a2) * x) * mf
        x, mirror_nodes = x_new, mirror_new

    # Highway: g = sigmoid(cat([h, x]) @ W_hw.T); x_dot = g*h + (1-g)*x
    hw = params["highway"]
    g = jax.nn.sigmoid(h @ hw[:, :D].T + x @ hw[:, D:].T)
    x_dot = g * h + (1.0 - g) * x
    hidden = x_dot

    # masked_select of the last item's representation (exactly one True / row)
    h_local = jnp.einsum("bl,bld->bd", last_item_mask.astype(x_dot.dtype), x_dot)
    h_mirror = mirror_nodes

    # compute_score_and_ssl_loss
    B, L, _ = hidden.shape
    mask_f = mask_item.astype(jnp.float32)                  # (B, L)
    pos_emb = params["pos_embedding"][:L]                   # (L, D)
    item_w = params["embedding"][1:]                        # (V, D)

    simi_loss = similarity_loss_pallas(hf_1, hf_2, simi_mask, temp=temp)   # kernel 3
    scores = compute_score_pallas(hidden, pos_emb, h_mirror, h_local,
                                  mask_f, item_w, params, mu=mu)           # kernels 2a/2b
    return simi_loss, scores


# ----------------------------------------------------------------------------
# Demo
# ----------------------------------------------------------------------------
if __name__ == "__main__":
    key = jax.random.PRNGKey(0)
    num_node = 40
    dim = 32
    B, L, S, K = 2, 8, 4, 2          # batch, seq len, attr samples, #attributes

    pkey, dkey = jax.random.split(key)
    params = init_params(pkey, num_node, dim)

    ks = jax.random.split(dkey, 8)
    inputs = jax.random.randint(ks[0], (B, L), 0, num_node, dtype=jnp.int32)
    adj = jax.random.randint(ks[1], (B, L, L), 0, 5, dtype=jnp.int32)
    last_idx = jnp.array([L - 1, L // 2])
    last_item_mask = jnp.arange(L)[None, :] == last_idx[:, None]           # (B, L) bool
    as_items = [jax.random.randint(ks[2 + k], (B, L, S), 0, num_node, dtype=jnp.int32)
                for k in range(K)]
    as_items_SSL = [jax.random.randint(ks[4 + k], (B, L, S), 0, num_node, dtype=jnp.int32)
                    for k in range(K)]
    simi_mask = jax.random.randint(ks[6], (B, L, L), 0, 2, dtype=jnp.int32)

    simi_loss, scores = combine_graph_forward(
        params, inputs, adj, last_item_mask, as_items, as_items_SSL, simi_mask)
    jax.block_until_ready((simi_loss, scores))
    assert scores.shape == (B, num_node - 1)
    assert simi_loss.shape == ()
    print("KERNEL_OK")
</pallas_src>

<mosaic_0001>
module attributes {stable_mosaic.version = 11 : i64} {
  func.func @local_agg_kernel(%arg0: i32, %arg1: memref<2x8x32xf32, #tpu.memory_space<vmem>>, %arg2: memref<2x8x8xi32, #tpu.memory_space<vmem>>, %arg3: memref<4x32xf32, #tpu.memory_space<vmem>>, %arg4: memref<2x8x32xf32, #tpu.memory_space<vmem>>) attributes {dimension_semantics = [#tpu.dimension_semantics<parallel>], iteration_bounds = array<i64: 1>, scalar_prefetch = 0 : i64, scratch_operands = 0 : i64, tpu.core_type = #tpu.core_type<tc>, window_params = [{transform_indices = @transform_0, window_bounds = array<i64: 2, 8, 32>}, {transform_indices = @transform_1, window_bounds = array<i64: 2, 8, 8>}, {pipeline_mode = #tpu.pipeline_mode<synchronous>, transform_indices = @transform_2, window_bounds = array<i64: 4, 32>}, {transform_indices = @transform_3, window_bounds = array<i64: 2, 8, 32>}]} {
    %c0 = arith.constant 0 : index
    %c0_0 = arith.constant 0 : index
    %c0_1 = arith.constant 0 : index
    %0 = vector.load %arg1[%c0, %c0_0, %c0_1] : memref<2x8x32xf32, #tpu.memory_space<vmem>>, vector<2x8x32xf32>
    %c0_2 = arith.constant 0 : index
    %c0_3 = arith.constant 0 : index
    %c0_4 = arith.constant 0 : index
    %1 = vector.load %arg2[%c0_2, %c0_3, %c0_4] : memref<2x8x8xi32, #tpu.memory_space<vmem>>, vector<2x8x8xi32>
    %c0_5 = arith.constant 0 : index
    %c0_6 = arith.constant 0 : index
    %2 = vector.load %arg3[%c0_5, %c0_6] : memref<4x32xf32, #tpu.memory_space<vmem>>, vector<4x32xf32>
    %3 = vector.extract_strided_slice %2 {offsets = [0, 0], sizes = [1, 32], strides = [1, 1]} : vector<4x32xf32> to vector<1x32xf32>
    %4 = vector.shape_cast %3 : vector<1x32xf32> to vector<32xf32>
    %5 = vector.shape_cast %4 : vector<32xf32> to vector<1x1x32xf32>
    %6 = vector.broadcast %5 : vector<1x1x32xf32> to vector<2x8x32xf32>
    %7 = arith.mulf %0, %6 : vector<2x8x32xf32>
    %8 = vector.extract_strided_slice %2 {offsets = [1, 0], sizes = [1, 32], strides = [1, 1]} : vector<4x32xf32> to vector<1x32xf32>
    %9 = vector.shape_cast %8 : vector<1x32xf32> to vector<32xf32>
    %10 = vector.shape_cast %9 : vector<32xf32> to vector<1x1x32xf32>
    %11 = vector.broadcast %10 : vector<1x1x32xf32> to vector<2x8x32xf32>
    %12 = arith.mulf %0, %11 : vector<2x8x32xf32>
    %13 = vector.extract_strided_slice %2 {offsets = [2, 0], sizes = [1, 32], strides = [1, 1]} : vector<4x32xf32> to vector<1x32xf32>
    %14 = vector.shape_cast %13 : vector<1x32xf32> to vector<32xf32>
    %15 = vector.shape_cast %14 : vector<32xf32> to vector<1x1x32xf32>
    %16 = vector.broadcast %15 : vector<1x1x32xf32> to vector<2x8x32xf32>
    %17 = arith.mulf %0, %16 : vector<2x8x32xf32>
    %18 = vector.extract_strided_slice %2 {offsets = [3, 0], sizes = [1, 32], strides = [1, 1]} : vector<4x32xf32> to vector<1x32xf32>
    %19 = vector.shape_cast %18 : vector<1x32xf32> to vector<32xf32>
    %20 = vector.shape_cast %19 : vector<32xf32> to vector<1x1x32xf32>
    %21 = vector.broadcast %20 : vector<1x1x32xf32> to vector<2x8x32xf32>
    %22 = arith.mulf %0, %21 : vector<2x8x32xf32>
    %23 = tpu.concatenate %7, %12, %17, %22 in 1 : vector<2x8x32xf32>, vector<2x8x32xf32>, vector<2x8x32xf32>, vector<2x8x32xf32> -> vector<2x32x32xf32>
    "tpu.trace_start"() <{level = 10 : i32, message = "bid,bjd->bij"}> : () -> ()
    %cst = arith.constant dense<0.000000e+00> : vector<2x32x8xf32>
    %24 = tpu.matmul %23, %0, %cst {dimension_numbers = #tpu.dot_dimension_numbers<[2], [2], [1], [1], [0, 0, 0, 1, 1, 1], [0], [0]>} : vector<2x32x32xf32>, vector<2x8x32xf32>, vector<2x32x8xf32> -> vector<2x32x8xf32>
    %cst_7 = arith.constant 0.000000e+00 : f32
    "tpu.trace_stop"() : () -> ()
    %25 = vector.broadcast %cst_7 : f32 to vector<2x32x8xf32>
    %26 = arith.cmpf oge, %24, %25 : vector<2x32x8xf32>
    %cst_8 = arith.constant 2.000000e-01 : f32
    %27 = vector.broadcast %cst_8 : f32 to vector<2x32x8xf32>
    %28 = arith.mulf %27, %24 : vector<2x32x8xf32>
    %29 = arith.select %26, %24, %28 : vector<2x32x8xi1>, vector<2x32x8xf32>
    %cst_9 = arith.constant -9.000000e+15 : f32
    %30 = vector.broadcast %cst_9 : f32 to vector<2x8x8xf32>
    %c1_i32 = arith.constant 1 : i32
    %31 = vector.broadcast %c1_i32 : i32 to vector<2x8x8xi32>
    %32 = arith.cmpi eq, %1, %31 : vector<2x8x8xi32>
    %33 = vector.extract_strided_slice %29 {offsets = [0, 0, 0], sizes = [2, 8, 8], strides = [1, 1, 1]} : vector<2x32x8xf32> to vector<2x8x8xf32>
    %34 = arith.select %32, %33, %30 : vector<2x8x8xi1>, vector<2x8x8xf32>
    %c2_i32 = arith.constant 2 : i32
    %35 = vector.broadcast %c2_i32 : i32 to vector<2x8x8xi32>
    %36 = arith.cmpi eq, %1, %35 : vector<2x8x8xi32>
    %37 = vector.extract_strided_slice %29 {offsets = [0, 8, 0], sizes = [2, 8, 8], strides = [1, 1, 1]} : vector<2x32x8xf32> to vector<2x8x8xf32>
    %38 = arith.select %36, %37, %34 : vector<2x8x8xi1>, vector<2x8x8xf32>
    %c3_i32 = arith.constant 3 : i32
    %39 = vector.broadcast %c3_i32 : i32 to vector<2x8x8xi32>
    %40 = arith.cmpi eq, %1, %39 : vector<2x8x8xi32>
    %41 = vector.extract_strided_slice %29 {offsets = [0, 16, 0], sizes = [2, 8, 8], strides = [1, 1, 1]} : vector<2x32x8xf32> to vector<2x8x8xf32>
    %42 = arith.select %40, %41, %38 : vector<2x8x8xi1>, vector<2x8x8xf32>
    %c4_i32 = arith.constant 4 : i32
    %43 = vector.broadcast %c4_i32 : i32 to vector<2x8x8xi32>
    %44 = arith.cmpi eq, %1, %43 : vector<2x8x8xi32>
    %45 = vector.extract_strided_slice %29 {offsets = [0, 24, 0], sizes = [2, 8, 8], strides = [1, 1, 1]} : vector<2x32x8xf32> to vector<2x8x8xf32>
    %46 = arith.select %44, %45, %42 : vector<2x8x8xi1>, vector<2x8x8xf32>
    %cst_10 = arith.constant dense<0xFF800000> : vector<2x8xf32>
    %47 = vector.multi_reduction <maximumf>, %46, %cst_10 [2] : vector<2x8x8xf32> to vector<2x8xf32>
    %48 = vector.shape_cast %47 : vector<2x8xf32> to vector<2x8x1xf32>
    %49 = vector.broadcast %48 : vector<2x8x1xf32> to vector<2x8x8xf32>
    %50 = arith.subf %46, %49 : vector<2x8x8xf32>
    %51 = math.exp %50 : vector<2x8x8xf32>
    %cst_11 = arith.constant dense<0.000000e+00> : vector<2x8xf32>
    %52 = vector.multi_reduction <add>, %51, %cst_11 [2] : vector<2x8x8xf32> to vector<2x8xf32>
    %53 = vector.shape_cast %52 : vector<2x8xf32> to vector<2x8x1xf32>
    %54 = vector.broadcast %53 : vector<2x8x1xf32> to vector<2x8x8xf32>
    %55 = arith.divf %51, %54 : vector<2x8x8xf32>
    "tpu.trace_start"() <{level = 10 : i32, message = "bij,bjd->bid"}> : () -> ()
    %cst_12 = arith.constant dense<0.000000e+00> : vector<2x8x32xf32>
    %56 = tpu.matmul %55, %0, %cst_12 {dimension_numbers = #tpu.dot_dimension_numbers<[2], [1], [1], [2], [0, 0, 0, 1, 1, 2], [0], [0]>} : vector<2x8x8xf32>, vector<2x8x32xf32>, vector<2x8x32xf32> -> vector<2x8x32xf32>
    "tpu.trace_stop"() : () -> ()
    %c0_13 = arith.constant 0 : index
    %c0_14 = arith.constant 0 : index
    %c0_15 = arith.constant 0 : index
    %57 = vector.load %arg4[%c0_13, %c0_14, %c0_15] : memref<2x8x32xf32, #tpu.memory_space<vmem>>, vector<2x8x32xf32>
    tpu.vector_store %arg4[%c0_13, %c0_14, %c0_15], %56 {strides = array<i32>} : memref<2x8x32xf32, #tpu.memory_space<vmem>>, vector<2x8x32xf32>,
    return
  }
  func.func @transform_0(%arg0: i32) -> (i32, i32, i32) {
    %c0_i32 = arith.constant 0 : i32
    %c0_i32_0 = arith.constant 0 : i32
    %c0_i32_1 = arith.constant 0 : i32
    return %arg0, %c0_i32, %c0_i32_0 : i32, i32, i32
  }
  func.func @transform_1(%arg0: i32) -> (i32, i32, i32) {
    %c0_i32 = arith.constant 0 : i32
    %c0_i32_0 = arith.constant 0 : i32
    %c0_i32_1 = arith.constant 0 : i32
    return %arg0, %c0_i32, %c0_i32_0 : i32, i32, i32
  }
  func.func @transform_2(%arg0: i32) -> (i32, i32) {
    %c0_i32 = arith.constant 0 : i32
    %c0_i32_0 = arith.constant 0 : i32
    %c0_i32_1 = arith.constant 0 : i32
    return %c0_i32, %c0_i32_0 : i32, i32
  }
  func.func @transform_3(%arg0: i32) -> (i32, i32, i32) {
    %c0_i32 = arith.constant 0 : i32
    %c0_i32_0 = arith.constant 0 : i32
    %c0_i32_1 = arith.constant 0 : i32
    return %arg0, %c0_i32, %c0_i32_0 : i32, i32, i32
  }
}

</mosaic_0001>

<bundles_post_ra>
// kernel: tpu_custom_call.1
= control target key start
LH: loop header
LB: loop body
LE: loop exit
PB: predicated region body
PF: predicated region fallthrough
CT: control target
= control target key end

     0   :  { %8 = vsyncpa [#allocation3], 0  ;;  %s763_s0 = inlined_call_operand.hbm [shape: f32[2,8,32], index: 0, kind: input, shape index: {}]   ;;  %s764_s1 = inlined_call_operand.hbm [shape: s32[2,8,8], index: 1, kind: input, shape index: {}]   ;;  %s765_s2 = inlined_call_operand.hbm [shape: f32[4,32], index: 2, kind: input, shape index: {}]   ;;  %s766_s3 = inlined_call_operand.hbm [shape: f32[2,8,32], index: 3, kind: output, shape index: {}]  }
   0x1   :  { %9 = vsyncpa [#allocation6], 0 }
   0x2   :  { %10 = vsyncpa [#allocation4], 0  ;;  %s667_s12 = smov [#allocation5]   ;;  %s668_s14 = smov [#allocation2]  }
   0x3   :  { %s28_s13 = sshll.u32 %s667_s12, 4  ;;  %s16_s15 = sshll.u32 %s668_s14, 4  ;;  %s29_s13 = int_to_ptr.vmem [resolvable:$true] %s28_s13  ;;  %s17_s15 = int_to_ptr.vmem [resolvable:$true] %s16_s15 }
   0x4   :  { %s589_s16 = scalar_lea.vmem %s29_s13, 256  ;;  %p594_p1 = scmp.lt.s32.totalorder %s29_s13, %s29_s13 }
   0x5   :  { %p590_p0 = scmp.ne.s32.totalorder %s29_s13, %s589_s16  ;;  %p595_p2 = scmp.lt.s32.totalorder %s589_s16, %s589_s16 }
   0x7   :  { %p596_p3 = por %p595_p2, %p594_p1 }
   0x9   :  { %p597_p4 = pnand %p596_p3, %p590_p0 }
   0xb   :  { %600 = shalt.err (!%p597_p4)
}
   0xc   :  { %s669_s17 = smov 128   ;;  %s670_s18 = smov 8  }
   0xd   :  { %34 = dma.hbm_to_vmem [thread:$0]  %s764_s1, 256, %s29_s13, [#allocation6], %s669_s17, %s669_s17, %s670_s18  }
   0xe   :  { %s609_s21 = scalar_lea.vmem %s17_s15, 256  ;;  %p614_p6 = scmp.lt.s32.totalorder %s17_s15, %s17_s15 }
   0xf   :  { %p610_p5 = scmp.ne.s32.totalorder %s17_s15, %s609_s21  ;;  %p615_p7 = scmp.lt.s32.totalorder %s609_s21, %s609_s21 }
  0x11   :  { %p616_p8 = por %p615_p7, %p614_p6 }
  0x13   :  { %p617_p9 = pnand %p616_p8, %p610_p5 }
  0x15   :  { %620 = shalt.err (!%p617_p9)
}
  0x16   :  { %22 = dma.hbm_to_vmem [thread:$0]  %s763_s0, 256, %s17_s15, [#allocation3], %s669_s17, %s669_s17, %s670_s18  }
  0x17   :  { %s671_s24 = smov [#allocation7]  }
  0x18   :  { %s41_s25 = sshll.u32 %s671_s24, 4  ;;  %s42_s25 = int_to_ptr.vmem [resolvable:$true] %s41_s25 }
  0x19   :  { %s629_s26 = scalar_lea.vmem %s42_s25, 64  ;;  %p634_p11 = scmp.lt.s32.totalorder %s42_s25, %s42_s25 }
  0x1a   :  { %p630_p10 = scmp.ne.s32.totalorder %s42_s25, %s629_s26  ;;  %p635_p12 = scmp.lt.s32.totalorder %s629_s26, %s629_s26 }
  0x1c   :  { %p636_p13 = por %p635_p12, %p634_p11 }
  0x1e   :  { %p637_p0 = pnand %p636_p13, %p630_p10 }
  0x20   :  { %640 = shalt.err (!%p637_p0)
}
  0x21   :  { %44 = dma.hbm_to_vmem [thread:$0]  %s765_s2, 64, %s42_s25, [#allocation6]  }
  0x22   :  { %661 = dma.done.wait [#allocation3], 256  }
  0x23   :  { %662 = vsyncadd [#allocation3], 4294967040 }
  0x24   :  { %663 = dma.done.wait [#allocation6], 320  }
  0x25   :  { %664 = vsyncadd [#allocation6], 4294966976  ;;  %v59_v0 = vlaneseq  ;;  %vm83_vm0 = vcmask 261120   ;;  %v710_v6 = vld [vmem:[#allocation2] sm:$0xff]  ;;  %v712_v7 = vld [vmem:[#allocation2 + $0x8] sm:$0xff]  ;;  %vm324_vm15 = vcmask 64512  }
  0x26   :  { %v58_v8 = vld [vmem:[#allocation7] sm:$0xf]  ;;  %539 = vmatprep.subr.msk.mxu0 %vm83_vm0, %v710_v6  ;;  %547 = vmatprep.subr.msk.mxu1 %vm83_vm0, %v712_v7  ;;  %v56_v21 = vld [vmem:[#allocation5] sm:$0xff]  ;;  %v57_v22 = vld [vmem:[#allocation5 + $0x8] sm:$0xff]  ;;  %s674_s0 = smov [#allocation8]  }
  0x27   :  { %v60_v1 = vshrl.u32 %v59_v0, 7  ;;  %540 = vmatpush3.xpose.msk.msra.mxu0 %vm83_vm0, %v710_v6  ;;  %548 = vmatpush3.xpose.msk.msra.mxu1 %vm83_vm0, %v712_v7  ;;  %vm308_vm1 = vcmp.eq.s32.totalorder %v56_v21, 1  ;;  %vm309_vm3 = vcmp.eq.s32.totalorder %v57_v22, 1  ;;  %vm312_vm4 = vcmp.eq.s32.totalorder %v56_v21, 2  ;;  %s500_s2 = sshll.u32 %s674_s0, 4  ;;  %s501_s2 = int_to_ptr.vmem [resolvable:$true] %s500_s2 }
  0x28   :  { %vm313_vm5 = vcmp.eq.s32.totalorder %v57_v22, 2  ;;  %vm316_vm7 = vcmp.eq.s32.totalorder %v56_v21, 3  ;;  %vm320_vm8 = vcmp.eq.s32.totalorder %v56_v21, 4  ;;  %s641_s28 = scalar_lea.vmem %s501_s2, 256  ;;  %p646_p2 = scmp.lt.s32.totalorder %s501_s2, %s501_s2 }
  0x29   :  { %v61_v2 = vsub.s32 0, %v60_v1  ;;  %v67_v3 = vsub.s32 1, %v60_v1  ;;  %v73_v4 = vsub.s32 2, %v60_v1  ;;  %v79_v5 = vsub.s32 3, %v60_v1  ;;  %p642_p1 = scmp.ne.s32.totalorder %s501_s2, %s641_s28  ;;  %p647_p3 = scmp.lt.s32.totalorder %s641_s28, %s641_s28 }
  0x2b   :  { %v62_v9 = vrot.slane %v58_v8, %v61_v2  ;;  %v68_v10 = vrot.slane %v58_v8, %v67_v3  ;;  %v74_v11 = vrot.slane %v58_v8, %v73_v4  ;;  %v80_v12 = vrot.slane %v58_v8, %v79_v5  ;;  %p648_p4 = por %p647_p3, %p646_p2 }
  0x2c   :  { %v672_v3 = vmov 0.0  }
  0x2d   :  { %v63_v13 = vmul.f32 %v62_v9, %v710_v6  ;;  %v64_v14 = vmul.f32 %v62_v9, %v712_v7  ;;  %v69_v15 = vmul.f32 %v68_v10, %v710_v6  ;;  %v70_v16 = vmul.f32 %v68_v10, %v712_v7  ;;  %555 = vmatprep.subr.mxu0 %v672_v3  ;;  %p649_p5 = pnand %p648_p4, %p642_p1 }
  0x2e   :  { %v75_v17 = vmul.f32 %v74_v11, %v710_v6  ;;  %v76_v18 = vmul.f32 %v74_v11, %v712_v7  ;;  %v81_v19 = vmul.f32 %v80_v12, %v710_v6  ;;  %v82_v20 = vmul.f32 %v80_v12, %v712_v7  ;;  %560 = vmatprep.subr.mxu1 %v672_v3 }
  0x2f   :  { %541 = vmatprep.mubr.msk.f32.mxu0 %vm83_vm0, %v63_v13  ;;  %549 = vmatprep.mubr.msk.f32.mxu1 %vm83_vm0, %v64_v14 }
  0x30   :  { %542 = vmatmul.mubr.msk.f32.vlgmr.msra.gmra.mxu0 %vm83_vm0, %v69_v15  ;;  %550 = vmatmul.mubr.msk.f32.vlgmr.msra.gmra.mxu1 %vm83_vm0, %v70_v16 }
  0x31   :  { %544 = vmatprep.mubr.msk.f32.mxu0 %vm83_vm0, %v75_v17  ;;  %552 = vmatprep.mubr.msk.f32.mxu1 %vm83_vm0, %v76_v18 }
  0x32   :  { %556 = vmatpush3.msra.mxu0 %v710_v6  ;;  %561 = vmatpush3.msra.mxu1 %v712_v7 }
  0x34   :  { %545 = vmatmul.mubr.msk.f32.gmra.mxu0 %vm83_vm0, %v81_v19  ;;  %553 = vmatmul.mubr.msk.f32.gmra.mxu1 %vm83_vm0, %v82_v20 }
  0xf0   :  { %v543_v23 = vpop.f32.mrf.mxu0  ;;  %v551_v24 = vpop.f32.mrf.mxu1 }
  0xf1   :  { %v297_v25 = vmul.f32 0.2, %v551_v24  ;;  %vm289_vm2 = vcmp.ge.f32.partialorder %v551_v24, 0.0  ;;  %vm285_vm9 = vcmp.ge.f32.partialorder %v543_v23, 0.0  ;;  %v293_v29 = vmul.f32 0.2, %v543_v23 }
  0xf2   :  { %v165_v26 = vpop.f32.mrf.mxu0  ;;  %v265_v27 = vpop.f32.mrf.mxu1 }
  0xf3   :  { %vm284_vm6 = vcmp.ge.f32.partialorder %v165_v26, 0.0  ;;  %v292_v28 = vmul.f32 0.2, %v165_v26  ;;  %vm288_vm10 = vcmp.ge.f32.partialorder %v265_v27, 0.0  ;;  %v296_v30 = vmul.f32 0.2, %v265_v27 }
  0xf4   :  { %v546_v31 = vpop.f32.mrf.mxu0  ;;  %v554_v32 = vpop.f32.mrf.mxu1  ;;  %v305_v33 = vsel %vm289_vm2, %v551_v24, %v297_v25  ;;  %v301_v43 = vsel %vm285_vm9, %v543_v23, %v293_v29  ;;  %vm317_vm2 = vcmp.eq.s32.totalorder %v57_v22, 3 }
  0xf5   :  { %v300_v34 = vsel %vm284_vm6, %v165_v26, %v292_v28  ;;  %vm287_vm11 = vcmp.ge.f32.partialorder %v546_v31, 0.0  ;;  %v295_v35 = vmul.f32 0.2, %v546_v31  ;;  %v304_v37 = vsel %vm288_vm10, %v265_v27, %v296_v30 }
  0xf6   :  { %v310_v36 = vsel %vm308_vm1, %v300_v34, -9e+15  ;;  %vm291_vm12 = vcmp.ge.f32.partialorder %v554_v32, 0.0  ;;  %v299_v38 = vmul.f32 0.2, %v554_v32  ;;  %v175_v39 = vpop.f32.mrf.mxu0  ;;  %v275_v40 = vpop.f32.mrf.mxu1  ;;  %vm321_vm1 = vcmp.eq.s32.totalorder %v57_v22, 4 }
  0xf7   :  { %v311_v41 = vsel %vm309_vm3, %v304_v37, -9e+15  ;;  %vm286_vm13 = vcmp.ge.f32.partialorder %v175_v39, 0.0  ;;  %v294_v42 = vmul.f32 0.2, %v175_v39  ;;  %vm290_vm14 = vcmp.ge.f32.partialorder %v275_v40, 0.0 }
  0xf8   :  { %v298_v44 = vmul.f32 0.2, %v275_v40  ;;  %v307_v45 = vsel %vm291_vm12, %v554_v32, %v299_v38  ;;  %v314_v47 = vsel %vm312_vm4, %v301_v43, %v310_v36  ;;  %v303_v49 = vsel %vm287_vm11, %v546_v31, %v295_v35 }
  0xf9   :  { %v302_v46 = vsel %vm286_vm13, %v175_v39, %v294_v42  ;;  %v315_v51 = vsel %vm313_vm5, %v305_v33, %v311_v41  ;;  %vm673_vm3 = vmmov 0  }
  0xfa   :  { %v306_v48 = vsel %vm290_vm14, %v275_v40, %v298_v44  ;;  %v318_v50 = vsel %vm316_vm7, %v302_v46, %v314_v47  ;;  %557 = vmatprep.mubr.msk.f32.mxu0 %vm673_vm3, %v672_v3  ;;  %562 = vmatprep.mubr.msk.f32.mxu1 %vm673_vm3, %v672_v3 }
  0xfb   :  { %v322_v52 = vsel %vm320_vm8, %v303_v49, %v318_v50  ;;  %v319_v53 = vsel %vm317_vm2, %v306_v48, %v315_v51 }
  0xfc   :  { %v325_v54 = vsel %vm324_vm15, %v322_v52, -inf  ;;  %v323_v55 = vsel %vm321_vm1, %v307_v45, %v319_v53 }
  0xfd   :  { %326 = vmax.xlane.f32.xlu0 %v325_v54  ;;  %v328_v56 = vsel %vm324_vm15, %v323_v55, -inf }
 0x101   :  { %329 = vmax.xlane.f32.xlu0 %v328_v56 }
 0x186   :  { %v327_v57 = vpop.xlane.xlu0 %326 }
 0x187   :  { %v331_v58 = vsub.f32 %v322_v52, %v327_v57 }
 0x189   :  { %v333_v59 = vmul.f32 1.442695, %v331_v58 }
 0x18a   :  { %v330_v60 = vpop.xlane.xlu0 %329 }
 0x18b   :  { %573 = vpow2.f32 %v333_v59  ;;  %v332_v61 = vsub.f32 %v323_v55, %v330_v60 }
 0x18d   :  { %v335_v62 = vmul.f32 1.442695, %v332_v61 }
 0x18f   :  { %575 = vpow2.f32 %v335_v62 }
 0x198   :  { %v574_v63 = vpop.eup %573 }
 0x199   :  { %v337_v0 = vsel %vm324_vm15, %v574_v63, 0.0 }
 0x19a   :  { %338 = vadd.xlane.f32.xlu1 %v337_v0 }
 0x19c   :  { %v576_v1 = vpop.eup %575 }
 0x19d   :  { %v340_v2 = vsel %vm324_vm15, %v576_v1, 0.0 }
 0x19e   :  { %341 = vadd.xlane.f32.xlu1 %v340_v2 }
 0x223   :  { %v339_v4 = vpop.xlane.xlu1 %338 }
 0x224   :  { %577 = vrcp.f32 %v339_v4 }
 0x227   :  { %v342_v5 = vpop.xlane.xlu1 %341 }
 0x228   :  { %579 = vrcp.f32 %v342_v5 }
 0x231   :  { %v578_v8 = vpop.eup %577 }
 0x232   :  { %v344_v9 = vmul.f32 %v578_v8, %v574_v63 }
 0x234   :  { %558 = vmatmul.mubr.msk.f32.vlgmr.msra.gmra.mxu0 %vm324_vm15, %v344_v9 }
 0x235   :  { %v580_v10 = vpop.eup %579 }
 0x236   :  { %v346_v11 = vmul.f32 %v580_v10, %v576_v1 }
 0x238   :  { %563 = vmatmul.mubr.msk.f32.vlgmr.msra.gmra.mxu1 %vm324_vm15, %v346_v11 }
 0x2f4   :  { %v416_v12 = vpop.f32.mrf.mxu0 }
 0x2f5   :  { %493 = vst.msk [vmem:[#allocation8] sm:$0xff] %vm83_vm0, %v416_v12 }
 0x2f6   :  { %v559_v6 = vpop.f32.mrf.mxu0 }
 0x2f8   :  { %v489_v7 = vpop.f32.mrf.mxu1 }
 0x2f9   :  { %494 = vst.msk [vmem:[#allocation8 + $0x8] sm:$0xff] %vm83_vm0, %v489_v7 }
 0x2fa   :  { %v564_v13 = vpop.f32.mrf.mxu1 }
 0x2fb   :  { %652 = shalt.err (!%p649_p5)
}
 0x2fc   :  { %506 = dma.vmem_to_hbm [thread:$0]  %s501_s2, 256, %s766_s3, [#allocation4], %s669_s17, %s669_s17, %s670_s18  }
 0x2fd   :  { %665 = dma.done.wait [#allocation4], 256  }
 0x2fe   :  { %666 = vsyncadd [#allocation4], 4294967040 }
 0x2ff   :  { %510 = vsyncpa [#allocation3], 1 }
 0x300   :  { %511 = vsyncpa [#allocation6], 1 }
 0x301   :  { %512 = vsyncpa [#allocation4], 1 }

</bundles_post_ra>
